<compile_context>
chip_gen: v6e
topology: v6e:2x2x1
jax: 0.10.0
libtpu: 0.0.40
codegen_flags: <defaults>
</compile_context>

<pallas_src>
import functools
import math

import jax
import jax.numpy as jnp
from jax.experimental import pallas as pl
from jax.experimental.pallas import tpu as pltpu

LN_EPS = 1e-12                       # BERT LayerNorm eps
VMEM_LIMIT_BYTES = 48 * 1024 * 1024  # scoped-VMEM budget (safe on v5e/v6e/v7x)


# ----------------------------- shared math helpers -------------------------

def _layernorm(x, gamma, beta):
    x = x.astype(jnp.float32)
    mu = jnp.mean(x, axis=-1, keepdims=True)
    var = jnp.mean((x - mu) ** 2, axis=-1, keepdims=True)
    return (x - mu) * jax.lax.rsqrt(var + LN_EPS) * gamma + beta


def _gelu(x):
    # TODO(synk): HF BERT uses exact erf-GELU; tanh approximation keeps the
    # transcendental on the EUP with a clean Mosaic lowering.
    return 0.5 * x * (1.0 + jnp.tanh(0.7978845608028654 * (x + 0.044715 * x * x * x)))


# --------------------------- attention + LN1 kernel -------------------------

def attn_kernel(xq_ref, xf_ref, mbias_ref,
                wq_ref, bq_ref, wk_ref, bk_ref, wv_ref, bv_ref,
                wo_ref, bo_ref, g1_ref, b1_ref, out_ref,
                *, num_heads, head_dim, scale):
    xq = xq_ref[0]                      # (TQ, H) bf16  query-side rows
    xf = xf_ref[0]                      # (S,  H) bf16  full sequence (keys/values)
    mbias = mbias_ref[0]                # (1,  S) f32   additive key mask

    # Projections: bf16 x bf16 -> f32 accumulation on the MXU.
    q = jnp.dot(xq, wq_ref[...], preferred_element_type=jnp.float32) + bq_ref[...]
    k = jnp.dot(xf, wk_ref[...], preferred_element_type=jnp.float32) + bk_ref[...]
    v = jnp.dot(xf, wv_ref[...], preferred_element_type=jnp.float32) + bv_ref[...]

    def split_heads(t):                 # (rows, H) -> (num_heads, rows, head_dim) bf16
        return jnp.stack(
            [t[:, h * head_dim:(h + 1) * head_dim] for h in range(num_heads)],
            axis=0).astype(jnp.bfloat16)

    # Fold 1/sqrt(head_dim) into q (TQ*H mults instead of TQ*S per head).
    qh = split_heads(q * scale)         # (nh, TQ, hd)
    kh = split_heads(k)                 # (nh, S,  hd)
    vh = split_heads(v)                 # (nh, S,  hd)

    # Batched over heads, contraction over head_dim -> no explicit kh.T.
    s = jnp.einsum('hqd,hkd->hqk', qh, kh,
                   preferred_element_type=jnp.float32)          # (nh, TQ, S)
    s = s + mbias                                               # broadcast (1, S)
    s = s - jnp.max(s, axis=-1, keepdims=True)
    p = jnp.exp(s)
    p = p * pl.reciprocal(jnp.sum(p, axis=-1, keepdims=True), approx=True)

    ctx_h = jnp.einsum('hqk,hkd->hqd', p.astype(jnp.bfloat16), vh,
                       preferred_element_type=jnp.float32)      # (nh, TQ, hd)
    ctx = jnp.concatenate([ctx_h[h] for h in range(num_heads)],
                          axis=-1).astype(jnp.bfloat16)         # (TQ, H)

    attn_out = jnp.dot(ctx, wo_ref[...],
                       preferred_element_type=jnp.float32) + bo_ref[...]
    h1 = _layernorm(xq.astype(jnp.float32) + attn_out, g1_ref[...], b1_ref[...])
    out_ref[0] = h1.astype(out_ref.dtype)


def pallas_attention_block(x, mbias, lp, *, num_heads, head_dim, tq):
    B, S, H = x.shape

    def const_spec(shape):
        return pl.BlockSpec(shape, lambda b, t: (0,) * len(shape))

    kernel = functools.partial(attn_kernel, num_heads=num_heads,
                               head_dim=head_dim,
                               scale=1.0 / math.sqrt(head_dim))
    return pl.pallas_call(
        kernel,
        out_shape=jax.ShapeDtypeStruct((B, S, H), jnp.bfloat16),
        grid=(B, S // tq),
        in_specs=[
            pl.BlockSpec((1, tq, H), lambda b, t: (b, t, 0)),   # query rows
            pl.BlockSpec((1, S, H), lambda b, t: (b, 0, 0)),    # full seq for K/V
            pl.BlockSpec((1, 1, S), lambda b, t: (b, 0, 0)),    # mask bias
            const_spec((H, H)), const_spec((1, H)),             # wq, bq
            const_spec((H, H)), const_spec((1, H)),             # wk, bk
            const_spec((H, H)), const_spec((1, H)),             # wv, bv
            const_spec((H, H)), const_spec((1, H)),             # wo, bo
            const_spec((1, H)), const_spec((1, H)),             # ln1 gamma, beta
        ],
        out_specs=pl.BlockSpec((1, tq, H), lambda b, t: (b, t, 0)),
        compiler_params=pltpu.CompilerParams(
            dimension_semantics=("parallel", "parallel"),
            vmem_limit_bytes=VMEM_LIMIT_BYTES),
    )(x, x, mbias,
      lp["wq"], lp["bq"], lp["wk"], lp["bk"], lp["wv"], lp["bv"],
      lp["wo"], lp["bo"], lp["ln1_g"], lp["ln1_b"])


# ------------------------------ FFN + LN2 kernel ----------------------------

def ffn_kernel(h_ref, wi_ref, bi_ref, w2_ref, b2_ref, g2_ref, bb2_ref, out_ref):
    h = h_ref[0]                                                # (TQ, H) bf16
    inter = jnp.dot(h, wi_ref[...], preferred_element_type=jnp.float32) + bi_ref[...]
    inter = _gelu(inter).astype(jnp.bfloat16)
    ffn = jnp.dot(inter, w2_ref[...], preferred_element_type=jnp.float32) + b2_ref[...]
    out_ref[0] = _layernorm(h.astype(jnp.float32) + ffn,
                            g2_ref[...], bb2_ref[...]).astype(out_ref.dtype)


def pallas_ffn_block(h, lp, *, tq):
    B, S, H = h.shape
    I = lp["wi"].shape[1]

    def const_spec(shape):
        return pl.BlockSpec(shape, lambda b, t: (0,) * len(shape))

    return pl.pallas_call(
        ffn_kernel,
        out_shape=jax.ShapeDtypeStruct((B, S, H), jnp.bfloat16),
        grid=(B, S // tq),
        in_specs=[
            pl.BlockSpec((1, tq, H), lambda b, t: (b, t, 0)),   # hidden rows
            const_spec((H, I)), const_spec((1, I)),             # wi, bi
            const_spec((I, H)), const_spec((1, H)),             # w2, b2
            const_spec((1, H)), const_spec((1, H)),             # ln2 gamma, beta
        ],
        out_specs=pl.BlockSpec((1, tq, H), lambda b, t: (b, t, 0)),
        compiler_params=pltpu.CompilerParams(
            dimension_semantics=("parallel", "parallel"),
            vmem_limit_bytes=VMEM_LIMIT_BYTES),
    )(h, lp["wi"], lp["bi"], lp["w2"], lp["b2"], lp["ln2_g"], lp["ln2_b"])


# ------------------------------- parameters --------------------------------

def init_params(key, vocab, H, I, L, max_pos):
    ks = jax.random.split(key, 3 + 12 * L)
    ki = iter(ks)

    def nf32(shape):
        return (0.02 * jax.random.normal(next(ki), shape)).astype(jnp.float32)

    def nbf16(shape):
        return nf32(shape).astype(jnp.bfloat16)    # weight matrices stored bf16

    params = {
        "word_emb": nf32((vocab, H)),
        "pos_emb": nf32((max_pos, H)),
        "type_emb": nf32((2, H)),
        "emb_ln_g": jnp.ones((1, H), jnp.float32),
        "emb_ln_b": jnp.zeros((1, H), jnp.float32),
        "layers": [],
    }
    for _ in range(L):
        params["layers"].append({
            "wq": nbf16((H, H)), "bq": nf32((1, H)),
            "wk": nbf16((H, H)), "bk": nf32((1, H)),
            "wv": nbf16((H, H)), "bv": nf32((1, H)),
            "wo": nbf16((H, H)), "bo": nf32((1, H)),
            "ln1_g": jnp.ones((1, H), jnp.float32), "ln1_b": jnp.zeros((1, H), jnp.float32),
            "wi": nbf16((H, I)), "bi": nf32((1, I)),
            "w2": nbf16((I, H)), "b2": nf32((1, H)),
            "ln2_g": jnp.ones((1, H), jnp.float32), "ln2_b": jnp.zeros((1, H), jnp.float32),
        })
    return params


# -------------------------------- forward -----------------------------------

def bert_forward(tokens, params, *, num_heads, seq_tile=None):
    B, S = tokens.shape
    H = params["word_emb"].shape[1]
    head_dim = H // num_heads
    tq = S if (seq_tile is None or S % seq_tile != 0) else seq_tile

    # attention_mask = (tokens > 0).float(); additive key bias like HF BERT
    mask = (tokens > 0).astype(jnp.float32)                     # (B, S)
    mbias = ((1.0 - mask) * -10000.0)[:, None, :]               # (B, 1, S)

    # Embeddings + LayerNorm: memory-bound glue, left to XLA (a dedicated
    # pallas kernel here adds launch/pipeline overhead with nothing to hide).
    x = (jnp.take(params["word_emb"], tokens, axis=0)
         + params["pos_emb"][:S][None] + params["type_emb"][0:1][None])
    x = _layernorm(x, params["emb_ln_g"], params["emb_ln_b"]).astype(jnp.bfloat16)

    for lp in params["layers"]:
        h1 = pallas_attention_block(x, mbias, lp, num_heads=num_heads,
                                    head_dim=head_dim, tq=tq)
        x = pallas_ffn_block(h1, lp, tq=tq)
    return x.astype(jnp.float32)


# ----------------------------- pure-JAX reference ----------------------------
# Mirrors the kernel numerics: bf16 matmul inputs, f32 accumulation, f32 LN.

def bert_reference(tokens, params, *, num_heads):
    B, S = tokens.shape
    H = params["word_emb"].shape[1]
    hd = H // num_heads
    scale = 1.0 / math.sqrt(hd)

    mask = (tokens > 0).astype(jnp.float32)
    mbias = ((1.0 - mask) * -10000.0)[:, None, :]               # (B, 1, S)

    x = (jnp.take(params["word_emb"], tokens, axis=0)
         + params["pos_emb"][:S][None] + params["type_emb"][0:1][None])
    x = _layernorm(x, params["emb_ln_g"], params["emb_ln_b"]).astype(jnp.bfloat16)

    for lp in params["layers"]:
        q = jnp.einsum("bsh,hd->bsd", x, lp["wq"],
                       preferred_element_type=jnp.float32) + lp["bq"]
        k = jnp.einsum("bsh,hd->bsd", x, lp["wk"],
                       preferred_element_type=jnp.float32) + lp["bk"]
        v = jnp.einsum("bsh,hd->bsd", x, lp["wv"],
                       preferred_element_type=jnp.float32) + lp["bv"]
        qh = (q * scale).reshape(B, S, num_heads, hd).astype(jnp.bfloat16)
        kh = k.reshape(B, S, num_heads, hd).astype(jnp.bfloat16)
        vh = v.reshape(B, S, num_heads, hd).astype(jnp.bfloat16)
        s = jnp.einsum("bqhd,bkhd->bhqk", qh, kh,
                       preferred_element_type=jnp.float32)
        s = s + mbias[:, None, :, :]
        s = s - jnp.max(s, axis=-1, keepdims=True)
        p = jnp.exp(s)
        p = p / jnp.sum(p, axis=-1, keepdims=True)
        ctx = jnp.einsum("bhqk,bkhd->bqhd", p.astype(jnp.bfloat16), vh,
                         preferred_element_type=jnp.float32)
        ctx = ctx.reshape(B, S, H).astype(jnp.bfloat16)
        ao = jnp.einsum("bsh,hd->bsd", ctx, lp["wo"],
                        preferred_element_type=jnp.float32) + lp["bo"]
        h1 = _layernorm(x.astype(jnp.float32) + ao,
                        lp["ln1_g"], lp["ln1_b"]).astype(jnp.bfloat16)
        inter = jnp.einsum("bsh,hi->bsi", h1, lp["wi"],
                           preferred_element_type=jnp.float32) + lp["bi"]
        inter = _gelu(inter).astype(jnp.bfloat16)
        ffn = jnp.einsum("bsi,ih->bsh", inter, lp["w2"],
                         preferred_element_type=jnp.float32) + lp["b2"]
        x = _layernorm(h1.astype(jnp.float32) + ffn,
                       lp["ln2_g"], lp["ln2_b"]).astype(jnp.bfloat16)
    return x.astype(jnp.float32)


# ---------------------------------- main ------------------------------------

if __name__ == "__main__":
    B, S, H, I = 2, 16, 32, 64
    NUM_HEADS, NUM_LAYERS, VOCAB, MAX_POS = 2, 2, 50, 64
    SEQ_TILE = 8    # -> grid = (B=2, S//TQ=2): exercises the sequence tiling

    key = jax.random.PRNGKey(0)
    kp, kt = jax.random.split(key)
    params = init_params(kp, VOCAB, H, I, NUM_LAYERS, MAX_POS)

    tokens = jax.random.randint(kt, (B, S), minval=1, maxval=VOCAB, dtype=jnp.int32)
    # introduce padding (token id 0) so the attention mask is exercised
    tokens = tokens.at[0, 13:].set(0)
    tokens = tokens.at[1, 10:].set(0)

    fwd = jax.jit(functools.partial(bert_forward, num_heads=NUM_HEADS,
                                    seq_tile=SEQ_TILE))
    out = jax.block_until_ready(fwd(tokens, params))

    ref_fn = jax.jit(functools.partial(bert_reference, num_heads=NUM_HEADS))
    ref = jax.block_until_ready(ref_fn(tokens, params))

    assert out.shape == (B, S, H)
    assert bool(jnp.all(jnp.isfinite(out)))
    max_err = float(jnp.max(jnp.abs(out - ref)))
    assert bool(jnp.allclose(out, ref, rtol=2e-2, atol=2e-2)), \
        f"mismatch vs reference (max abs err {max_err})"

    print("KERNEL_OK")
</pallas_src>

<mosaic_0001>
module attributes {stable_mosaic.version = 11 : i64} {
  func.func @ffn_kernel(%arg0: i32, %arg1: i32, %arg2: memref<1x8x32xbf16, #tpu.memory_space<vmem>>, %arg3: memref<32x64xbf16, #tpu.memory_space<vmem>>, %arg4: memref<1x64xf32, #tpu.memory_space<vmem>>, %arg5: memref<64x32xbf16, #tpu.memory_space<vmem>>, %arg6: memref<1x32xf32, #tpu.memory_space<vmem>>, %arg7: memref<1x32xf32, #tpu.memory_space<vmem>>, %arg8: memref<1x32xf32, #tpu.memory_space<vmem>>, %arg9: memref<1x8x32xbf16, #tpu.memory_space<vmem>>) attributes {dimension_semantics = [#tpu.dimension_semantics<parallel>, #tpu.dimension_semantics<parallel>], iteration_bounds = array<i64: 2, 2>, scalar_prefetch = 0 : i64, scratch_operands = 0 : i64, tpu.core_type = #tpu.core_type<tc>, window_params = [{transform_indices = @transform_0, window_bounds = array<i64: 1, 8, 32>}, {pipeline_mode = #tpu.pipeline_mode<synchronous>, transform_indices = @transform_1, window_bounds = array<i64: 32, 64>}, {pipeline_mode = #tpu.pipeline_mode<synchronous>, transform_indices = @transform_2, window_bounds = array<i64: 1, 64>}, {pipeline_mode = #tpu.pipeline_mode<synchronous>, transform_indices = @transform_3, window_bounds = array<i64: 64, 32>}, {pipeline_mode = #tpu.pipeline_mode<synchronous>, transform_indices = @transform_4, window_bounds = array<i64: 1, 32>}, {pipeline_mode = #tpu.pipeline_mode<synchronous>, transform_indices = @transform_5, window_bounds = array<i64: 1, 32>}, {pipeline_mode = #tpu.pipeline_mode<synchronous>, transform_indices = @transform_6, window_bounds = array<i64: 1, 32>}, {transform_indices = @transform_7, window_bounds = array<i64: 1, 8, 32>}]} {
    %c0 = arith.constant 0 : index
    %c0_0 = arith.constant 0 : index
    %c0_1 = arith.constant 0 : index
    %0 = vector.load %arg2[%c0, %c0_0, %c0_1] : memref<1x8x32xbf16, #tpu.memory_space<vmem>>, vector<1x8x32xbf16>
    %1 = vector.shape_cast %0 : vector<1x8x32xbf16> to vector<8x32xbf16>
    %c0_2 = arith.constant 0 : index
    %c0_3 = arith.constant 0 : index
    %2 = vector.load %arg3[%c0_2, %c0_3] : memref<32x64xbf16, #tpu.memory_space<vmem>>, vector<32x64xbf16>
    %cst = arith.constant dense<0.000000e+00> : vector<8x64xf32>
    %3 = tpu.matmul %1, %2, %cst {dimension_numbers = #tpu.dot_dimension_numbers<[1], [0], [0], [1], [0, 0, 1, 1], [], []>} : vector<8x32xbf16>, vector<32x64xbf16>, vector<8x64xf32> -> vector<8x64xf32>
    %c0_4 = arith.constant 0 : index
    %c0_5 = arith.constant 0 : index
    %4 = vector.load %arg4[%c0_4, %c0_5] : memref<1x64xf32, #tpu.memory_space<vmem>>, vector<1x64xf32>
    %5 = vector.broadcast %4 : vector<1x64xf32> to vector<8x64xf32>
    %6 = arith.addf %3, %5 : vector<8x64xf32>
    %cst_6 = arith.constant 5.000000e-01 : f32
    %7 = vector.broadcast %cst_6 : f32 to vector<8x64xf32>
    %8 = arith.mulf %7, %6 : vector<8x64xf32>
    %cst_7 = arith.constant 4.471500e-02 : f32
    %9 = vector.broadcast %cst_7 : f32 to vector<8x64xf32>
    %10 = arith.mulf %9, %6 : vector<8x64xf32>
    %11 = arith.mulf %10, %6 : vector<8x64xf32>
    %12 = arith.mulf %11, %6 : vector<8x64xf32>
    %13 = arith.addf %6, %12 : vector<8x64xf32>
    %cst_8 = arith.constant 0.797884583 : f32
    %14 = vector.broadcast %cst_8 : f32 to vector<8x64xf32>
    %15 = arith.mulf %14, %13 : vector<8x64xf32>
    %16 = math.tanh %15 : vector<8x64xf32>
    %cst_9 = arith.constant 1.000000e+00 : f32
    %17 = vector.broadcast %cst_9 : f32 to vector<8x64xf32>
    %18 = arith.addf %17, %16 : vector<8x64xf32>
    %19 = arith.mulf %8, %18 : vector<8x64xf32>
    %20 = arith.truncf %19 : vector<8x64xf32> to vector<8x64xbf16>
    %c0_10 = arith.constant 0 : index
    %c0_11 = arith.constant 0 : index
    %21 = vector.load %arg5[%c0_10, %c0_11] : memref<64x32xbf16, #tpu.memory_space<vmem>>, vector<64x32xbf16>
    %cst_12 = arith.constant dense<0.000000e+00> : vector<8x32xf32>
    %22 = tpu.matmul %20, %21, %cst_12 {dimension_numbers = #tpu.dot_dimension_numbers<[1], [0], [0], [1], [0, 0, 1, 1], [], []>} : vector<8x64xbf16>, vector<64x32xbf16>, vector<8x32xf32> -> vector<8x32xf32>
    %c0_13 = arith.constant 0 : index
    %c0_14 = arith.constant 0 : index
    %23 = vector.load %arg6[%c0_13, %c0_14] : memref<1x32xf32, #tpu.memory_space<vmem>>, vector<1x32xf32>
    %24 = vector.broadcast %23 : vector<1x32xf32> to vector<8x32xf32>
    %25 = arith.addf %22, %24 : vector<8x32xf32>
    %26 = arith.extf %1 : vector<8x32xbf16> to vector<8x32xf32>
    %27 = arith.addf %26, %25 : vector<8x32xf32>
    %c0_15 = arith.constant 0 : index
    %c0_16 = arith.constant 0 : index
    %28 = vector.load %arg7[%c0_15, %c0_16] : memref<1x32xf32, #tpu.memory_space<vmem>>, vector<1x32xf32>
    %c0_17 = arith.constant 0 : index
    %c0_18 = arith.constant 0 : index
    %29 = vector.load %arg8[%c0_17, %c0_18] : memref<1x32xf32, #tpu.memory_space<vmem>>, vector<1x32xf32>
    %cst_19 = arith.constant dense<0.000000e+00> : vector<8xf32>
    %30 = vector.multi_reduction <add>, %27, %cst_19 [1] : vector<8x32xf32> to vector<8xf32>
    %31 = vector.shape_cast %30 : vector<8xf32> to vector<8x1xf32>
    %cst_20 = arith.constant 3.200000e+01 : f32
    %32 = vector.broadcast %cst_20 : f32 to vector<8x1xf32>
    %33 = arith.divf %31, %32 : vector<8x1xf32>
    %34 = vector.broadcast %33 : vector<8x1xf32> to vector<8x32xf32>
    %35 = arith.subf %27, %34 : vector<8x32xf32>
    %36 = arith.mulf %35, %35 : vector<8x32xf32>
    %cst_21 = arith.constant dense<0.000000e+00> : vector<8xf32>
    %37 = vector.multi_reduction <add>, %36, %cst_21 [1] : vector<8x32xf32> to vector<8xf32>
    %38 = vector.shape_cast %37 : vector<8xf32> to vector<8x1xf32>
    %cst_22 = arith.constant 3.200000e+01 : f32
    %39 = vector.broadcast %cst_22 : f32 to vector<8x1xf32>
    %40 = arith.divf %38, %39 : vector<8x1xf32>
    %41 = vector.broadcast %33 : vector<8x1xf32> to vector<8x32xf32>
    %42 = arith.subf %27, %41 : vector<8x32xf32>
    %cst_23 = arith.constant 9.99999996E-13 : f32
    %43 = vector.broadcast %cst_23 : f32 to vector<8x1xf32>
    %44 = arith.addf %40, %43 : vector<8x1xf32>
    %45 = math.rsqrt %44 : vector<8x1xf32>
    %46 = vector.broadcast %45 : vector<8x1xf32> to vector<8x32xf32>
    %47 = arith.mulf %42, %46 : vector<8x32xf32>
    %48 = vector.broadcast %28 : vector<1x32xf32> to vector<8x32xf32>
    %49 = arith.mulf %47, %48 : vector<8x32xf32>
    %50 = vector.broadcast %29 : vector<1x32xf32> to vector<8x32xf32>
    %51 = arith.addf %49, %50 : vector<8x32xf32>
    %52 = arith.truncf %51 : vector<8x32xf32> to vector<8x32xbf16>
    %c0_24 = arith.constant 0 : index
    %c0_25 = arith.constant 0 : index
    %c0_26 = arith.constant 0 : index
    %53 = vector.load %arg9[%c0_24, %c0_25, %c0_26] : memref<1x8x32xbf16, #tpu.memory_space<vmem>>, vector<1x8x32xbf16>
    %54 = vector.shape_cast %53 : vector<1x8x32xbf16> to vector<8x32xbf16>
    %55 = vector.shape_cast %52 : vector<8x32xbf16> to vector<1x8x32xbf16>
    tpu.vector_store %arg9[%c0_24, %c0_25, %c0_26], %55 {strides = array<i32>} : memref<1x8x32xbf16, #tpu.memory_space<vmem>>, vector<1x8x32xbf16>,
    return
  }
  func.func @transform_0(%arg0: i32, %arg1: i32) -> (i32, i32, i32) {
    %c0_i32 = arith.constant 0 : i32
    %c0_i32_0 = arith.constant 0 : i32
    return %arg0, %arg1, %c0_i32 : i32, i32, i32
  }
  func.func @transform_1(%arg0: i32, %arg1: i32) -> (i32, i32) {
    %c0_i32 = arith.constant 0 : i32
    %c0_i32_0 = arith.constant 0 : i32
    %c0_i32_1 = arith.constant 0 : i32
    return %c0_i32, %c0_i32_0 : i32, i32
  }
  func.func @transform_2(%arg0: i32, %arg1: i32) -> (i32, i32) {
    %c0_i32 = arith.constant 0 : i32
    %c0_i32_0 = arith.constant 0 : i32
    %c0_i32_1 = arith.constant 0 : i32
    return %c0_i32, %c0_i32_0 : i32, i32
  }
  func.func @transform_3(%arg0: i32, %arg1: i32) -> (i32, i32) {
    %c0_i32 = arith.constant 0 : i32
    %c0_i32_0 = arith.constant 0 : i32
    %c0_i32_1 = arith.constant 0 : i32
    return %c0_i32, %c0_i32_0 : i32, i32
  }
  func.func @transform_4(%arg0: i32, %arg1: i32) -> (i32, i32) {
    %c0_i32 = arith.constant 0 : i32
    %c0_i32_0 = arith.constant 0 : i32
    %c0_i32_1 = arith.constant 0 : i32
    return %c0_i32, %c0_i32_0 : i32, i32
  }
  func.func @transform_5(%arg0: i32, %arg1: i32) -> (i32, i32) {
    %c0_i32 = arith.constant 0 : i32
    %c0_i32_0 = arith.constant 0 : i32
    %c0_i32_1 = arith.constant 0 : i32
    return %c0_i32, %c0_i32_0 : i32, i32
  }
  func.func @transform_6(%arg0: i32, %arg1: i32) -> (i32, i32) {
    %c0_i32 = arith.constant 0 : i32
    %c0_i32_0 = arith.constant 0 : i32
    %c0_i32_1 = arith.constant 0 : i32
    return %c0_i32, %c0_i32_0 : i32, i32
  }
  func.func @transform_7(%arg0: i32, %arg1: i32) -> (i32, i32, i32) {
    %c0_i32 = arith.constant 0 : i32
    %c0_i32_0 = arith.constant 0 : i32
    return %arg0, %arg1, %c0_i32 : i32, i32, i32
  }
}

module attributes {stable_mosaic.version = 11 : i64} {
  func.func @attn_kernel(%arg0: i32, %arg1: i32, %arg2: memref<1x8x32xbf16, #tpu.memory_space<vmem>>, %arg3: memref<1x16x32xbf16, #tpu.memory_space<vmem>>, %arg4: memref<1x1x16xf32, #tpu.memory_space<vmem>>, %arg5: memref<32x32xbf16, #tpu.memory_space<vmem>>, %arg6: memref<1x32xf32, #tpu.memory_space<vmem>>, %arg7: memref<32x32xbf16, #tpu.memory_space<vmem>>, %arg8: memref<1x32xf32, #tpu.memory_space<vmem>>, %arg9: memref<32x32xbf16, #tpu.memory_space<vmem>>, %arg10: memref<1x32xf32, #tpu.memory_space<vmem>>, %arg11: memref<32x32xbf16, #tpu.memory_space<vmem>>, %arg12: memref<1x32xf32, #tpu.memory_space<vmem>>, %arg13: memref<1x32xf32, #tpu.memory_space<vmem>>, %arg14: memref<1x32xf32, #tpu.memory_space<vmem>>, %arg15: memref<1x8x32xbf16, #tpu.memory_space<vmem>>) attributes {dimension_semantics = [#tpu.dimension_semantics<parallel>, #tpu.dimension_semantics<parallel>], iteration_bounds = array<i64: 2, 2>, scalar_prefetch = 0 : i64, scratch_operands = 0 : i64, tpu.core_type = #tpu.core_type<tc>, window_params = [{transform_indices = @transform_0, window_bounds = array<i64: 1, 8, 32>}, {transform_indices = @transform_1, window_bounds = array<i64: 1, 16, 32>}, {transform_indices = @transform_2, window_bounds = array<i64: 1, 1, 16>}, {pipeline_mode = #tpu.pipeline_mode<synchronous>, transform_indices = @transform_3, window_bounds = array<i64: 32, 32>}, {pipeline_mode = #tpu.pipeline_mode<synchronous>, transform_indices = @transform_4, window_bounds = array<i64: 1, 32>}, {pipeline_mode = #tpu.pipeline_mode<synchronous>, transform_indices = @transform_5, window_bounds = array<i64: 32, 32>}, {pipeline_mode = #tpu.pipeline_mode<synchronous>, transform_indices = @transform_6, window_bounds = array<i64: 1, 32>}, {pipeline_mode = #tpu.pipeline_mode<synchronous>, transform_indices = @transform_7, window_bounds = array<i64: 32, 32>}, {pipeline_mode = #tpu.pipeline_mode<synchronous>, transform_indices = @transform_8, window_bounds = array<i64: 1, 32>}, {pipeline_mode = #tpu.pipeline_mode<synchronous>, transform_indices = @transform_9, window_bounds = array<i64: 32, 32>}, {pipeline_mode = #tpu.pipeline_mode<synchronous>, transform_indices = @transform_10, window_bounds = array<i64: 1, 32>}, {pipeline_mode = #tpu.pipeline_mode<synchronous>, transform_indices = @transform_11, window_bounds = array<i64: 1, 32>}, {pipeline_mode = #tpu.pipeline_mode<synchronous>, transform_indices = @transform_12, window_bounds = array<i64: 1, 32>}, {transform_indices = @transform_13, window_bounds = array<i64: 1, 8, 32>}]} {
    %c0 = arith.constant 0 : index
    %c0_0 = arith.constant 0 : index
    %c0_1 = arith.constant 0 : index
    %0 = vector.load %arg2[%c0, %c0_0, %c0_1] : memref<1x8x32xbf16, #tpu.memory_space<vmem>>, vector<1x8x32xbf16>
    %1 = vector.shape_cast %0 : vector<1x8x32xbf16> to vector<8x32xbf16>
    %c0_2 = arith.constant 0 : index
    %c0_3 = arith.constant 0 : index
    %c0_4 = arith.constant 0 : index
    %2 = vector.load %arg3[%c0_2, %c0_3, %c0_4] : memref<1x16x32xbf16, #tpu.memory_space<vmem>>, vector<1x16x32xbf16>
    %3 = vector.shape_cast %2 : vector<1x16x32xbf16> to vector<16x32xbf16>
    %c0_5 = arith.constant 0 : index
    %c0_6 = arith.constant 0 : index
    %c0_7 = arith.constant 0 : index
    %4 = vector.load %arg4[%c0_5, %c0_6, %c0_7] : memref<1x1x16xf32, #tpu.memory_space<vmem>>, vector<1x1x16xf32>
    %5 = vector.shape_cast %4 : vector<1x1x16xf32> to vector<1x16xf32>
    %c0_8 = arith.constant 0 : index
    %c0_9 = arith.constant 0 : index
    %6 = vector.load %arg5[%c0_8, %c0_9] : memref<32x32xbf16, #tpu.memory_space<vmem>>, vector<32x32xbf16>
    %cst = arith.constant dense<0.000000e+00> : vector<8x32xf32>
    %7 = tpu.matmul %1, %6, %cst {dimension_numbers = #tpu.dot_dimension_numbers<[1], [0], [0], [1], [0, 0, 1, 1], [], []>} : vector<8x32xbf16>, vector<32x32xbf16>, vector<8x32xf32> -> vector<8x32xf32>
    %c0_10 = arith.constant 0 : index
    %c0_11 = arith.constant 0 : index
    %8 = vector.load %arg6[%c0_10, %c0_11] : memref<1x32xf32, #tpu.memory_space<vmem>>, vector<1x32xf32>
    %9 = vector.broadcast %8 : vector<1x32xf32> to vector<8x32xf32>
    %10 = arith.addf %7, %9 : vector<8x32xf32>
    %c0_12 = arith.constant 0 : index
    %c0_13 = arith.constant 0 : index
    %11 = vector.load %arg7[%c0_12, %c0_13] : memref<32x32xbf16, #tpu.memory_space<vmem>>, vector<32x32xbf16>
    %cst_14 = arith.constant dense<0.000000e+00> : vector<16x32xf32>
    %12 = tpu.matmul %3, %11, %cst_14 {dimension_numbers = #tpu.dot_dimension_numbers<[1], [0], [0], [1], [0, 0, 1, 1], [], []>} : vector<16x32xbf16>, vector<32x32xbf16>, vector<16x32xf32> -> vector<16x32xf32>
    %c0_15 = arith.constant 0 : index
    %c0_16 = arith.constant 0 : index
    %13 = vector.load %arg8[%c0_15, %c0_16] : memref<1x32xf32, #tpu.memory_space<vmem>>, vector<1x32xf32>
    %14 = vector.broadcast %13 : vector<1x32xf32> to vector<16x32xf32>
    %15 = arith.addf %12, %14 : vector<16x32xf32>
    %c0_17 = arith.constant 0 : index
    %c0_18 = arith.constant 0 : index
    %16 = vector.load %arg9[%c0_17, %c0_18] : memref<32x32xbf16, #tpu.memory_space<vmem>>, vector<32x32xbf16>
    %cst_19 = arith.constant dense<0.000000e+00> : vector<16x32xf32>
    %17 = tpu.matmul %3, %16, %cst_19 {dimension_numbers = #tpu.dot_dimension_numbers<[1], [0], [0], [1], [0, 0, 1, 1], [], []>} : vector<16x32xbf16>, vector<32x32xbf16>, vector<16x32xf32> -> vector<16x32xf32>
    %c0_20 = arith.constant 0 : index
    %c0_21 = arith.constant 0 : index
    %18 = vector.load %arg10[%c0_20, %c0_21] : memref<1x32xf32, #tpu.memory_space<vmem>>, vector<1x32xf32>
    %19 = vector.broadcast %18 : vector<1x32xf32> to vector<16x32xf32>
    %20 = arith.addf %17, %19 : vector<16x32xf32>
    %cst_22 = arith.constant 2.500000e-01 : f32
    %21 = vector.broadcast %cst_22 : f32 to vector<8x32xf32>
    %22 = arith.mulf %10, %21 : vector<8x32xf32>
    %23 = vector.extract_strided_slice %22 {offsets = [0, 0], sizes = [8, 16], strides = [1, 1]} : vector<8x32xf32> to vector<8x16xf32>
    %24 = vector.extract_strided_slice %22 {offsets = [0, 16], sizes = [8, 16], strides = [1, 1]} : vector<8x32xf32> to vector<8x16xf32>
    %25 = vector.shape_cast %23 : vector<8x16xf32> to vector<1x8x16xf32>
    %26 = vector.shape_cast %24 : vector<8x16xf32> to vector<1x8x16xf32>
    %27 = tpu.concatenate %25, %26 in 0 : vector<1x8x16xf32>, vector<1x8x16xf32> -> vector<2x8x16xf32>
    %28 = arith.truncf %27 : vector<2x8x16xf32> to vector<2x8x16xbf16>
    %29 = vector.extract_strided_slice %15 {offsets = [0, 0], sizes = [16, 16], strides = [1, 1]} : vector<16x32xf32> to vector<16x16xf32>
    %30 = vector.extract_strided_slice %15 {offsets = [0, 16], sizes = [16, 16], strides = [1, 1]} : vector<16x32xf32> to vector<16x16xf32>
    %31 = vector.shape_cast %29 : vector<16x16xf32> to vector<1x16x16xf32>
    %32 = vector.shape_cast %30 : vector<16x16xf32> to vector<1x16x16xf32>
    %33 = tpu.concatenate %31, %32 in 0 : vector<1x16x16xf32>, vector<1x16x16xf32> -> vector<2x16x16xf32>
    %34 = arith.truncf %33 : vector<2x16x16xf32> to vector<2x16x16xbf16>
    %35 = vector.extract_strided_slice %20 {offsets = [0, 0], sizes = [16, 16], strides = [1, 1]} : vector<16x32xf32> to vector<16x16xf32>
    %36 = vector.extract_strided_slice %20 {offsets = [0, 16], sizes = [16, 16], strides = [1, 1]} : vector<16x32xf32> to vector<16x16xf32>
    %37 = vector.shape_cast %35 : vector<16x16xf32> to vector<1x16x16xf32>
    %38 = vector.shape_cast %36 : vector<16x16xf32> to vector<1x16x16xf32>
    %39 = tpu.concatenate %37, %38 in 0 : vector<1x16x16xf32>, vector<1x16x16xf32> -> vector<2x16x16xf32>
    %40 = arith.truncf %39 : vector<2x16x16xf32> to vector<2x16x16xbf16>
    "tpu.trace_start"() <{level = 10 : i32, message = "hqd,hkd->hqk"}> : () -> ()
    %cst_23 = arith.constant dense<0.000000e+00> : vector<2x8x16xf32>
    %41 = tpu.matmul %28, %34, %cst_23 {dimension_numbers = #tpu.dot_dimension_numbers<[2], [2], [1], [1], [0, 0, 0, 1, 1, 1], [0], [0]>} : vector<2x8x16xbf16>, vector<2x16x16xbf16>, vector<2x8x16xf32> -> vector<2x8x16xf32>
    "tpu.trace_stop"() : () -> ()
    %42 = vector.shape_cast %5 : vector<1x16xf32> to vector<1x1x16xf32>
    %43 = vector.broadcast %42 : vector<1x1x16xf32> to vector<2x8x16xf32>
    %44 = arith.addf %41, %43 : vector<2x8x16xf32>
    %cst_24 = arith.constant dense<0xFF800000> : vector<2x8xf32>
    %45 = vector.multi_reduction <maximumf>, %44, %cst_24 [2] : vector<2x8x16xf32> to vector<2x8xf32>
    %46 = vector.shape_cast %45 : vector<2x8xf32> to vector<2x8x1xf32>
    %47 = vector.broadcast %46 : vector<2x8x1xf32> to vector<2x8x16xf32>
    %48 = arith.subf %44, %47 : vector<2x8x16xf32>
    %49 = math.exp %48 : vector<2x8x16xf32>
    %cst_25 = arith.constant dense<0.000000e+00> : vector<2x8xf32>
    %50 = vector.multi_reduction <add>, %49, %cst_25 [2] : vector<2x8x16xf32> to vector<2x8xf32>
    %51 = vector.shape_cast %50 : vector<2x8xf32> to vector<2x8x1xf32>
    %52 = tpu.reciprocal %51 {approx = true} : vector<2x8x1xf32> -> vector<2x8x1xf32>
    %53 = vector.broadcast %52 : vector<2x8x1xf32> to vector<2x8x16xf32>
    %54 = arith.mulf %49, %53 : vector<2x8x16xf32>
    %55 = arith.truncf %54 : vector<2x8x16xf32> to vector<2x8x16xbf16>
    "tpu.trace_start"() <{level = 10 : i32, message = "hqk,hkd->hqd"}> : () -> ()
    %cst_26 = arith.constant dense<0.000000e+00> : vector<2x8x16xf32>
    %56 = tpu.matmul %55, %40, %cst_26 {dimension_numbers = #tpu.dot_dimension_numbers<[2], [1], [1], [2], [0, 0, 0, 1, 1, 2], [0], [0]>} : vector<2x8x16xbf16>, vector<2x16x16xbf16>, vector<2x8x16xf32> -> vector<2x8x16xf32>
    "tpu.trace_stop"() : () -> ()
    %57 = vector.extract_strided_slice %56 {offsets = [0, 0, 0], sizes = [1, 8, 16], strides = [1, 1, 1]} : vector<2x8x16xf32> to vector<1x8x16xf32>
    %58 = vector.shape_cast %57 : vector<1x8x16xf32> to vector<8x16xf32>
    %59 = vector.extract_strided_slice %56 {offsets = [1, 0, 0], sizes = [1, 8, 16], strides = [1, 1, 1]} : vector<2x8x16xf32> to vector<1x8x16xf32>
    %60 = vector.shape_cast %59 : vector<1x8x16xf32> to vector<8x16xf32>
    %61 = tpu.concatenate %58, %60 in 1 : vector<8x16xf32>, vector<8x16xf32> -> vector<8x32xf32>
    %62 = arith.truncf %61 : vector<8x32xf32> to vector<8x32xbf16>
    %c0_27 = arith.constant 0 : index
    %c0_28 = arith.constant 0 : index
    %63 = vector.load %arg11[%c0_27, %c0_28] : memref<32x32xbf16, #tpu.memory_space<vmem>>, vector<32x32xbf16>
    %cst_29 = arith.constant dense<0.000000e+00> : vector<8x32xf32>
    %64 = tpu.matmul %62, %63, %cst_29 {dimension_numbers = #tpu.dot_dimension_numbers<[1], [0], [0], [1], [0, 0, 1, 1], [], []>} : vector<8x32xbf16>, vector<32x32xbf16>, vector<8x32xf32> -> vector<8x32xf32>
    %c0_30 = arith.constant 0 : index
    %c0_31 = arith.constant 0 : index
    %65 = vector.load %arg12[%c0_30, %c0_31] : memref<1x32xf32, #tpu.memory_space<vmem>>, vector<1x32xf32>
    %66 = vector.broadcast %65 : vector<1x32xf32> to vector<8x32xf32>
    %67 = arith.addf %64, %66 : vector<8x32xf32>
    %68 = arith.extf %1 : vector<8x32xbf16> to vector<8x32xf32>
    %69 = arith.addf %68, %67 : vector<8x32xf32>
    %c0_32 = arith.constant 0 : index
    %c0_33 = arith.constant 0 : index
    %70 = vector.load %arg13[%c0_32, %c0_33] : memref<1x32xf32, #tpu.memory_space<vmem>>, vector<1x32xf32>
    %c0_34 = arith.constant 0 : index
    %c0_35 = arith.constant 0 : index
    %71 = vector.load %arg14[%c0_34, %c0_35] : memref<1x32xf32, #tpu.memory_space<vmem>>, vector<1x32xf32>
    %cst_36 = arith.constant dense<0.000000e+00> : vector<8xf32>
    %72 = vector.multi_reduction <add>, %69, %cst_36 [1] : vector<8x32xf32> to vector<8xf32>
    %73 = vector.shape_cast %72 : vector<8xf32> to vector<8x1xf32>
    %cst_37 = arith.constant 3.200000e+01 : f32
    %74 = vector.broadcast %cst_37 : f32 to vector<8x1xf32>
    %75 = arith.divf %73, %74 : vector<8x1xf32>
    %76 = vector.broadcast %75 : vector<8x1xf32> to vector<8x32xf32>
    %77 = arith.subf %69, %76 : vector<8x32xf32>
    %78 = arith.mulf %77, %77 : vector<8x32xf32>
    %cst_38 = arith.constant dense<0.000000e+00> : vector<8xf32>
    %79 = vector.multi_reduction <add>, %78, %cst_38 [1] : vector<8x32xf32> to vector<8xf32>
    %80 = vector.shape_cast %79 : vector<8xf32> to vector<8x1xf32>
    %cst_39 = arith.constant 3.200000e+01 : f32
    %81 = vector.broadcast %cst_39 : f32 to vector<8x1xf32>
    %82 = arith.divf %80, %81 : vector<8x1xf32>
    %83 = vector.broadcast %75 : vector<8x1xf32> to vector<8x32xf32>
    %84 = arith.subf %69, %83 : vector<8x32xf32>
    %cst_40 = arith.constant 9.99999996E-13 : f32
    %85 = vector.broadcast %cst_40 : f32 to vector<8x1xf32>
    %86 = arith.addf %82, %85 : vector<8x1xf32>
    %87 = math.rsqrt %86 : vector<8x1xf32>
    %88 = vector.broadcast %87 : vector<8x1xf32> to vector<8x32xf32>
    %89 = arith.mulf %84, %88 : vector<8x32xf32>
    %90 = vector.broadcast %70 : vector<1x32xf32> to vector<8x32xf32>
    %91 = arith.mulf %89, %90 : vector<8x32xf32>
    %92 = vector.broadcast %71 : vector<1x32xf32> to vector<8x32xf32>
    %93 = arith.addf %91, %92 : vector<8x32xf32>
    %94 = arith.truncf %93 : vector<8x32xf32> to vector<8x32xbf16>
    %c0_41 = arith.constant 0 : index
    %c0_42 = arith.constant 0 : index
    %c0_43 = arith.constant 0 : index
    %95 = vector.load %arg15[%c0_41, %c0_42, %c0_43] : memref<1x8x32xbf16, #tpu.memory_space<vmem>>, vector<1x8x32xbf16>
    %96 = vector.shape_cast %95 : vector<1x8x32xbf16> to vector<8x32xbf16>
    %97 = vector.shape_cast %94 : vector<8x32xbf16> to vector<1x8x32xbf16>
    tpu.vector_store %arg15[%c0_41, %c0_42, %c0_43], %97 {strides = array<i32>} : memref<1x8x32xbf16, #tpu.memory_space<vmem>>, vector<1x8x32xbf16>,
    return
  }
  func.func @transform_0(%arg0: i32, %arg1: i32) -> (i32, i32, i32) {
    %c0_i32 = arith.constant 0 : i32
    %c0_i32_0 = arith.constant 0 : i32
    return %arg0, %arg1, %c0_i32 : i32, i32, i32
  }
  func.func @transform_1(%arg0: i32, %arg1: i32) -> (i32, i32, i32) {
    %c0_i32 = arith.constant 0 : i32
    %c0_i32_0 = arith.constant 0 : i32
    %c0_i32_1 = arith.constant 0 : i32
    return %arg0, %c0_i32, %c0_i32_0 : i32, i32, i32
  }
  func.func @transform_2(%arg0: i32, %arg1: i32) -> (i32, i32, i32) {
    %c0_i32 = arith.constant 0 : i32
    %c0_i32_0 = arith.constant 0 : i32
    %c0_i32_1 = arith.constant 0 : i32
    return %arg0, %c0_i32, %c0_i32_0 : i32, i32, i32
  }
  func.func @transform_3(%arg0: i32, %arg1: i32) -> (i32, i32) {
    %c0_i32 = arith.constant 0 : i32
    %c0_i32_0 = arith.constant 0 : i32
    %c0_i32_1 = arith.constant 0 : i32
    return %c0_i32, %c0_i32_0 : i32, i32
  }
  func.func @transform_4(%arg0: i32, %arg1: i32) -> (i32, i32) {
    %c0_i32 = arith.constant 0 : i32
    %c0_i32_0 = arith.constant 0 : i32
    %c0_i32_1 = arith.constant 0 : i32
    return %c0_i32, %c0_i32_0 : i32, i32
  }
  func.func @transform_5(%arg0: i32, %arg1: i32) -> (i32, i32) {
    %c0_i32 = arith.constant 0 : i32
    %c0_i32_0 = arith.constant 0 : i32
    %c0_i32_1 = arith.constant 0 : i32
    return %c0_i32, %c0_i32_0 : i32, i32
  }
  func.func @transform_6(%arg0: i32, %arg1: i32) -> (i32, i32) {
    %c0_i32 = arith.constant 0 : i32
    %c0_i32_0 = arith.constant 0 : i32
    %c0_i32_1 = arith.constant 0 : i32
    return %c0_i32, %c0_i32_0 : i32, i32
  }
  func.func @transform_7(%arg0: i32, %arg1: i32) -> (i32, i32) {
    %c0_i32 = arith.constant 0 : i32
    %c0_i32_0 = arith.constant 0 : i32
    %c0_i32_1 = arith.constant 0 : i32
    return %c0_i32, %c0_i32_0 : i32, i32
  }
  func.func @transform_8(%arg0: i32, %arg1: i32) -> (i32, i32) {
    %c0_i32 = arith.constant 0 : i32
    %c0_i32_0 = arith.constant 0 : i32
    %c0_i32_1 = arith.constant 0 : i32
    return %c0_i32, %c0_i32_0 : i32, i32
  }
  func.func @transform_9(%arg0: i32, %arg1: i32) -> (i32, i32) {
    %c0_i32 = arith.constant 0 : i32
    %c0_i32_0 = arith.constant 0 : i32
    %c0_i32_1 = arith.constant 0 : i32
    return %c0_i32, %c0_i32_0 : i32, i32
  }
  func.func @transform_10(%arg0: i32, %arg1: i32) -> (i32, i32) {
    %c0_i32 = arith.constant 0 : i32
    %c0_i32_0 = arith.constant 0 : i32
    %c0_i32_1 = arith.constant 0 : i32
    return %c0_i32, %c0_i32_0 : i32, i32
  }
  func.func @transform_11(%arg0: i32, %arg1: i32) -> (i32, i32) {
    %c0_i32 = arith.constant 0 : i32
    %c0_i32_0 = arith.constant 0 : i32
    %c0_i32_1 = arith.constant 0 : i32
    return %c0_i32, %c0_i32_0 : i32, i32
  }
  func.func @transform_12(%arg0: i32, %arg1: i32) -> (i32, i32) {
    %c0_i32 = arith.constant 0 : i32
    %c0_i32_0 = arith.constant 0 : i32
    %c0_i32_1 = arith.constant 0 : i32
    return %c0_i32, %c0_i32_0 : i32, i32
  }
  func.func @transform_13(%arg0: i32, %arg1: i32) -> (i32, i32, i32) {
    %c0_i32 = arith.constant 0 : i32
    %c0_i32_0 = arith.constant 0 : i32
    return %arg0, %arg1, %c0_i32 : i32, i32, i32
  }
}

</mosaic_0001>

<bundles_post_ra>
// kernel: bert_forward.5
= control target key start
LH: loop header
LB: loop body
LE: loop exit
PB: predicated region body
PF: predicated region fallthrough
CT: control target
= control target key end

     0   :  { %s778_s24 = smov 0   ;;  %s780_s25 = smov 0   ;;  %s869_s0 = inlined_call_operand.vmem [shape: bf16[2,16,32], index: 0, kind: input, shape index: {}]   ;;  %s870_s1 = inlined_call_operand.vmem [shape: bf16[32,64], index: 1, kind: input, shape index: {}]   ;;  %s871_s2 = inlined_call_operand.vmem [shape: f32[1,64], index: 2, kind: input, shape index: {}]   ;;  %s872_s3 = inlined_call_operand.vmem [shape: bf16[64,32], index: 3, kind: input, shape index: {}]   ;;  %s873_s4 = inlined_call_operand.vmem [shape: f32[1,32], index: 4, kind: input, shape index: {}]   ;;  %s874_s5 = inlined_call_operand.vmem [shape: f32[1,32], index: 5, kind: input, shape index: {}]   ;;  %s875_s6 = inlined_call_operand.vmem [shape: f32[1,32], index: 6, kind: input, shape index: {}]   ;;  %s876_s7 = inlined_call_operand.vmem [shape: bf16[2,16,32], index: 7, kind: output, shape index: {}]  }
   0x1   :  { %s782_s26 = smov 0   ;;  %s784_s27 = smov 0  }
   0x2   :  { %s786_s28 = smov 0  }
   0x3 LB: > { %s26_s29 = sadd.s32 1, %s726_s26  ;;  %s29_s30 = sadd.s32 1, %s730_s27  ;;  %s734_s28 = sphi %s786_s28, %s17_s28   ;;  %s730_s27 = sphi %s784_s27, %s880_s27   ;;  %s726_s26 = sphi %s782_s26, %s879_s26   ;;  %s722_s25 = sphi %s780_s25, %s878_s25   ;;  %s718_s24 = sphi %s778_s24, %s877_s24  }
   0x4   : > { %p27_p0 = scmp.ge.s32.totalorder %s26_s29, 2  ;;  %p597_p1 = scmp.ge.s32.totalorder %s734_s28, 1 }
   0x5   : > { %p256_p2 = scmp.lt.s32.totalorder %s734_s28, 5 }
   0x6   : > { %s882_s29 = smov (%p27_p0, %s26_s29), 0  ;;  %s884_s30 = smov (!%p27_p0, %s29_s30), %s730_s27 }
   0x7   : > { %p257_p3 = pnand %p597_p1, %p256_p2  ;;  %p31_p4 = scmp.ge.s32.totalorder %s884_s30, 2 }
   0x8   : > { %p294_p5 = scmp.lt.s32.totalorder (!%p257_p3), %s722_s25, 1  ;;  %p296_p6 = scmp.lt.s32.totalorder (!%p257_p3), %s718_s24, 1 }
   0x9   : > { %s886_s30 = smov (%p31_p4, %s884_s30), 0  ;;  %260 = sbr.rel (%p257_p3) target bundleno = 756 (0x2f4), region = 48 }
   0xe   : > { %v686_v0 = vld [vmem:[%s870_s1 + $0x8] sm:$0xff]   ;;  %v736_v1 = vmov 0.0   ;;  %v687_v2 = vld [vmem:[%s870_s1] sm:$0xff]   ;;  %vm737_vm0 = vmmov 0   ;;  %s888_s25 = smov (!%p294_p5, %s722_s25), 1  ;;  %s890_s24 = smov (!%p296_p6, %s718_s24), 1 }
   0xf   : > { %624 = vmatprep.subr.bf16.mxu0 %v736_v1  ;;  %632 = vmatprep.subr.bf16.mxu1 %v736_v1  ;;  %s598_s12 = sshll.u32 %s888_s25, 1  ;;  %vm335_vm1 = vcmask 261120   ;;  %v688_v4 = vld [vmem:[%s872_s3 + $0x18] sm:$0xff]   ;;  %v689_v5 = vld [vmem:[%s872_s3 + $0x10] sm:$0xff]   ;;  %v690_v6 = vld [vmem:[%s872_s3 + $0x8] sm:$0xff]   ;;  %vm428_vm2 = vcmask 523264  }
  0x10   : > { %625 = vmatpush3.bf16.msra.mxu0 %v686_v0  ;;  %628 = vmatprep.mubr.msk.bf16.mxu0 %vm737_vm0, %v736_v1  ;;  %s814_s13 = sadd.s32 %s598_s12, %s890_s24  ;;  %v691_v7 = vld [vmem:[%s872_s3] sm:$0xff]   ;;  %vm505_vm3 = vcmask 257024  }
  0x11   : > { %626 = vmatprep.subr.bf16.mxu0 %v736_v1  ;;  %640 = vmatprep.mubr.msk.bf16.mxu1 %vm737_vm0, %v736_v1  ;;  %s599_s14 = sshll.u32 %s814_s13, 2  ;;  %v602_v8 = vld [vmem:[%s871_s2] ss:$0 sm:$0xff] }
  0x12   : > { %s301_s17 = scalar_lea.vmem %s869_s0, %s599_s14  ;;  %633 = vmatpush3.bf16.msra.mxu1 %v688_v4  ;;  %v606_v24 = vld [vmem:[%s873_s4] ss:$0 sm:$0xff]  ;;  %s309_s20 = scalar_lea.vmem %s876_s7, %s599_s14 }
  0x13   : > { %v311_v3 = vld [vmem:[%s301_s17] sm:$0xf]  ;;  %634 = vmatprep.subr.bf16.mxu1 %v736_v1 }
  0x14   : > { %627 = vmatpush3.bf16.msra.mxu0 %v687_v2  ;;  %v472_v25 = vunpack.c.l.bf16 %v311_v3  ;;  %v612_v42 = vld [vmem:[%s874_s5] ss:$0 sm:$0xff] }
  0x15   : > { %v613_v44 = vld [vmem:[%s875_s6] ss:$0 sm:$0xff] }
  0x16   : > { %635 = vmatpush3.bf16.msra.mxu1 %v689_v5 }
  0x17   : > { %629 = vmatmul.mubr.msk.bf16.vlgmr.msra.gmra.mxu0 %vm335_vm1, %v311_v3  ;;  %636 = vmatprep.subr.bf16.mxu1 %v736_v1 }
  0x1a   : > { %637 = vmatpush3.bf16.msra.mxu1 %v690_v6 }
  0x1b   : > { %638 = vmatprep.subr.bf16.mxu1 %v736_v1 }
  0x1e   : > { %639 = vmatpush3.bf16.msra.mxu1 %v691_v7 }
  0xd7   : > { %v373_v9 = vpop.f32.mrf.mxu0 }
  0xd8   : > { %v374_v10 = vadd.f32 %v602_v8, %v373_v9 }
  0xd9   : > { %v630_v11 = vpop.f32.mrf.mxu0 }
  0xda   : > { %v380_v12 = vmul.f32 0.044715, %v374_v10  ;;  %v379_v20 = vmul.f32 0.5, %v374_v10 }
  0xdb   : > { %v376_v13 = vpop.f32.mrf.mxu0 }
  0xdc   : > { %v381_v14 = vmul.f32 %v380_v12, %v374_v10 }
  0xdd   : > { %v631_v15 = vpop.f32.mrf.mxu0 }
  0xde   : > { %v382_v16 = vmul.f32 %v381_v14, %v374_v10 }
  0xe0   : > { %v383_v17 = vadd.f32 %v382_v16, %v374_v10 }
  0xe2   : > { %v384_v18 = vmul.f32 0.7978846, %v383_v17 }
  0xe4   : > { %692 = vtanh.f32 %v384_v18 }
  0xf1   : > { %v693_v19 = vpop.eup %692 }
  0xf2   : > { %v386_v21 = vadd.f32 1.0, %v693_v19 }
  0xf4   : > { %v387_v22 = vmul.f32 %v386_v21, %v379_v20 }
  0xf6   : > { %v388_v23 = vpack.c.bf16 %v387_v22, %v387_v22 }
  0xf8   : > { %641 = vmatmul.mubr.msk.bf16.vlgmr.msra.gmra.mxu1 %vm428_vm2, %v388_v23 }
 0x1b8   : > { %v466_v26 = vpop.f32.mrf.mxu1 }
 0x1b9   : > { %v467_v27 = vadd.f32 %v606_v24, %v466_v26 }
 0x1ba   : > { %v642_v28 = vpop.f32.mrf.mxu1 }
 0x1bb   : > { %v473_v29 = vadd.f32 %v472_v25, %v467_v27 }
 0x1bc   : > { %v469_v30 = vpop.f32.mrf.mxu1 }
 0x1bd   : > { %v476_v31 = vsel %vm335_vm1, %v473_v29, 0.0 }
 0x1be   : > { %477 = vadd.xlane.f32.xlu0 %v476_v31  ;;  %v643_v32 = vpop.f32.mrf.mxu1 }
 0x247   : > { %v478_v33 = vpop.xlane.xlu0 %477 }
 0x248   : > { %v480_v34 = vmul.f32 0.03125, %v478_v33 }
 0x24a   : > { %v481_v35 = vsub.f32 %v473_v29, %v480_v34 }
 0x24c   : > { %v482_v36 = vmul.f32 %v481_v35, %v481_v35 }
 0x24e   : > { %v483_v37 = vsel %vm335_vm1, %v482_v36, 0.0 }
 0x24f   : > { %484 = vadd.xlane.f32.xlu0 %v483_v37 }
 0x2d8   : > { %v485_v38 = vpop.xlane.xlu0 %484 }
 0x2d9   : > { %v486_v39 = vmul.f32 0.03125, %v485_v38 }
 0x2db   : > { %v487_v40 = vadd.f32 1e-12, %v486_v39 }
 0x2dd   : > { %694 = vrsqrt.f32 %v487_v40 }
 0x2ea   : > { %v695_v41 = vpop.eup %694 }
 0x2eb   : > { %v489_v43 = vmul.f32 %v695_v41, %v481_v35 }
 0x2ed   : > { %v496_v45 = vmul.f32 %v612_v42, %v489_v43 }
 0x2ef   : > { %v503_v46 = vadd.f32 %v613_v44, %v496_v45 }
 0x2f1   : > { %v504_v47 = vpack.c.bf16 %v503_v46, %v503_v46 }
 0x2f3   : > { %506 = vst.msk [vmem:[%s309_s20] sm:$0xf] %vm505_vm3, %v504_v47 }
 0x2f4 PF: > { %s17_s28 = sadd.s32 1, %s734_s28   ;;  %s877_s24 = smov %s726_s26 }
 0x2f5   : > { %p14_p7 = scmp.ge.s32.totalorder %s17_s28, 6   ;;  %s878_s25 = smov %s730_s27 }
 0x2f6   : > { %s879_s26 = smov %s882_s29  ;;  %s880_s27 = smov %s886_s30 }
 0x2f7   :  { %16 = sbr.rel (!%p14_p7) target bundleno = 3 (0x3), region = 78 }

// kernel: bert_forward.4
= control target key start
LH: loop header
LB: loop body
LE: loop exit
PB: predicated region body
PF: predicated region fallthrough
CT: control target
= control target key end

     0   :  { %s1465_s25 = smov 0   ;;  %s1467_s26 = smov 0   ;;  %s1632_s0 = inlined_call_operand.vmem [shape: bf16[2,16,32], index: 0, kind: input, shape index: {}, may-alias: {0,1}]   ;;  %s1633_s1 = inlined_call_operand.vmem [shape: bf16[2,16,32], index: 1, kind: input, shape index: {}, may-alias: {0,1}]   ;;  %s1634_s2 = inlined_call_operand.vmem [shape: f32[2,1,16], index: 2, kind: input, shape index: {}]   ;;  %s1635_s3 = inlined_call_operand.vmem [shape: bf16[32,32], index: 3, kind: input, shape index: {}]   ;;  %s1636_s4 = inlined_call_operand.vmem [shape: f32[1,32], index: 4, kind: input, shape index: {}]   ;;  %s1637_s5 = inlined_call_operand.vmem [shape: bf16[32,32], index: 5, kind: input, shape index: {}]   ;;  %s1638_s6 = inlined_call_operand.vmem [shape: f32[1,32], index: 6, kind: input, shape index: {}]   ;;  %s1639_s7 = inlined_call_operand.vmem [shape: bf16[32,32], index: 7, kind: input, shape index: {}]   ;;  %s1640_s8 = inlined_call_operand.vmem [shape: f32[1,32], index: 8, kind: input, shape index: {}]   ;;  %s1641_s9 = inlined_call_operand.vmem [shape: bf16[32,32], index: 9, kind: input, shape index: {}]   ;;  %s1642_s10 = inlined_call_operand.vmem [shape: f32[1,32], index: 10, kind: input, shape index: {}]   ;;  %s1643_s11 = inlined_call_operand.vmem [shape: f32[1,32], index: 11, kind: input, shape index: {}]   ;;  %s1644_s12 = inlined_call_operand.vmem [shape: f32[1,32], index: 12, kind: input, shape index: {}]   ;;  %s1645_s13 = inlined_call_operand.vmem [shape: bf16[2,16,32], index: 13, kind: output, shape index: {}]  }
   0x1   :  { %s1469_s27 = smov 0   ;;  %s1471_s28 = smov 0  }
   0x2   :  { %s1473_s29 = smov 0  }
   0x3 LB: > { %s32_s30 = sadd.s32 1, %s1381_s27  ;;  %s35_s14 = sadd.s32 1, %s1385_s28  ;;  %s1389_s29 = sphi %s1473_s29, %s23_s29   ;;  %s1385_s28 = sphi %s1471_s28, %s1649_s28   ;;  %s1381_s27 = sphi %s1469_s27, %s1648_s27   ;;  %s1377_s26 = sphi %s1467_s26, %s1647_s26   ;;  %s1373_s25 = sphi %s1465_s25, %s1646_s25  }
   0x4   : > { %p33_p0 = scmp.ge.s32.totalorder %s32_s30, 2  ;;  %p1168_p1 = scmp.ge.s32.totalorder %s1389_s29, 1 }
   0x5   : > { %p424_p2 = scmp.lt.s32.totalorder %s1389_s29, 5 }
   0x6   : > { %s1651_s30 = smov (%p33_p0, %s32_s30), 0  ;;  %s1653_s14 = smov (!%p33_p0, %s35_s14), %s1385_s28 }
   0x7   : > { %p425_p3 = pnand %p1168_p1, %p424_p2  ;;  %p37_p4 = scmp.ge.s32.totalorder %s1653_s14, 2 }
   0x8   : > { %p482_p5 = scmp.lt.s32.totalorder (!%p425_p3), %s1377_s26, 1  ;;  %p484_p6 = scmp.lt.s32.totalorder (!%p425_p3), %s1373_s25, 1 }
   0x9   : > { %s1655_s14 = smov (%p37_p4, %s1653_s14), 0  ;;  %428 = sbr.rel (%p425_p3) target bundleno = 1679 (0x68f), region = 72 }
   0xe   : > { %v1332_v0 = vld [vmem:[%s1637_s5 + $0x8] sm:$0xff]   ;;  %v1391_v1 = vmov 0.0   ;;  %v1333_v2 = vld [vmem:[%s1637_s5] sm:$0xff]   ;;  %vm1392_vm0 = vmmov 0   ;;  %s1657_s26 = smov (!%p482_p5, %s1377_s26), 1  ;;  %vm534_vm1 = vcmask 261120  }
   0xf   : > { %1230 = vmatprep.subr.bf16.mxu1 %v1391_v1  ;;  %1222 = vmatprep.subr.bf16.mxu0 %v1391_v1  ;;  %v1335_v3 = vld [vmem:[%s1635_s3 + $0x8] sm:$0xff]   ;;  %v1336_v4 = vld [vmem:[%s1635_s3] sm:$0xff]   ;;  %s1659_s25 = smov (!%p484_p6, %s1373_s25), 1  ;;  %s1201_s23 = sshll.u32 %s1657_s26, 3  ;;  %vm747_vm2 = vcmask 130048   ;;  %vm1055_vm3 = vcmask 257024  }
  0x10   : > { %1231 = vmatpush3.bf16.msra.mxu1 %v1332_v0  ;;  %1234 = vmatprep.mubr.msk.bf16.mxu1 %vm1392_vm0, %v1391_v1  ;;  %s1169_s24 = sshll.u32 %s1657_s26, 1  ;;  %s494_s17 = scalar_lea.vmem %s1633_s1, %s1201_s23  ;;  %v1337_v7 = vld [vmem:[%s1639_s7 + $0x8] sm:$0xff]   ;;  %v1338_v8 = vld [vmem:[%s1639_s7] sm:$0xff]  }
  0x11   : > { %1232 = vmatprep.subr.bf16.mxu1 %v1391_v1  ;;  %1226 = vmatprep.mubr.msk.bf16.mxu0 %vm1392_vm0, %v1391_v1  ;;  %s1526_s18 = sadd.s32 %s1169_s24, %s1659_s25  ;;  %v1334_v5 = vld [vmem:[%s494_s17] sm:$0xff]   ;;  %s497_s16 = scalar_lea.vmem %s1634_s2, %s1657_s26 }
  0x12   : > { %1223 = vmatpush3.bf16.msra.mxu0 %v1335_v3  ;;  %s1170_s19 = sshll.u32 %s1526_s18, 2  ;;  %v1179_v10 = vld [vmem:[%s1638_s6] ss:$0 sm:$0xff] }
  0x13   : > { %1224 = vmatprep.subr.bf16.mxu0 %v1391_v1  ;;  %s489_s22 = scalar_lea.vmem %s1632_s0, %s1170_s19  ;;  %v1175_v12 = vld [vmem:[%s1636_s4] ss:$0 sm:$0xff]  ;;  %s505_s21 = scalar_lea.vmem %s1645_s13, %s1170_s19 }
  0x14   : > { %1233 = vmatpush3.bf16.msra.mxu1 %v1333_v2  ;;  %v1536_v6 = vld [vmem:[%s489_s22] sm:$0xf]  ;;  %s1393_s22 = smov 112  }
  0x15   : > { %1246 = vmatprep.subr.bf16.mxu1 %v1391_v1  ;;  %v1184_v27 = vld [vmem:[%s1640_s8] ss:$0 sm:$0xff] }
  0x16   : > { %1225 = vmatpush3.bf16.msra.mxu0 %v1336_v4  ;;  %v1188_v47 = vld [vmem:[%s497_s16] ss:$0 sm:$0xff] }
  0x17   : > { %1235 = vmatmul.mubr.msk.bf16.vlgmr.msra.gmra.mxu1 %vm534_vm1, %v1334_v5  ;;  %1238 = vmatprep.subr.bf16.mxu0 %v1391_v1 }
  0x18   : > { %1248 = vmatprep.mubr.msk.bf16.mxu1 %vm1392_vm0, %v1391_v1 }
  0x19   : > { %1227 = vmatmul.mubr.msk.bf16.vlgmr.msra.gmra.mxu0 %vm534_vm1, %v1536_v6 }
  0x1a   : > { %1242 = vmatprep.mubr.msk.bf16.mxu0 %vm1392_vm0, %v1391_v1  ;;  %1239 = vmatpush3.bf16.msra.mxu0 %v1337_v7 }
  0x1b   : > { %1240 = vmatprep.subr.bf16.mxu0 %v1391_v1 }
  0x1e   : > { %1241 = vmatpush3.bf16.msra.mxu0 %v1338_v8 }
  0x1f   : > { %1252 = vmatprep.subr.bf16.mxu0 %v1391_v1 }
  0x21   : > { %1243 = vmatmul.mubr.msk.bf16.vlgmr.msra.gmra.mxu0 %vm534_vm1, %v1334_v5 }
  0x22   : > { %1254 = vmatprep.mubr.msk.bf16.mxu0 %vm1392_vm0, %v1391_v1 }
  0xd7   : > { %v643_v9 = vpop.f32.mrf.mxu1 }
  0xd8   : > { %v644_v16 = vadd.f32 %v1179_v10, %v643_v9 }
  0xd9   : > { %v1236_v11 = vpop.f32.mrf.mxu1  ;;  %v572_v13 = vpop.f32.mrf.mxu0 }
  0xda   : > { %v573_v18 = vadd.f32 %v1175_v12, %v572_v13 }
  0xdb   : > { %v646_v14 = vpop.f32.mrf.mxu1  ;;  %v1228_v15 = vpop.f32.mrf.mxu0 }
  0xdc   : > { %v647_v17 = vadd.f32 %v1179_v10, %v646_v14  ;;  %v714_v24 = vmul.f32 0.25, %v573_v18 }
  0xdd   : > { %v1237_v19 = vpop.f32.mrf.mxu1  ;;  %v575_v20 = vpop.f32.mrf.mxu0 }
  0xde   : > { %v729_v21 = vpack.c.bf16 %v647_v17, %v644_v16  ;;  %v1322_v22 = vpack.i.bf16 %v647_v17, %v644_v16  ;;  %v719_v26 = vpack.c.bf16 %v714_v24, %v714_v24  ;;  %v1339_v16 = vld [vmem:[%s1641_s9 + $0x8] sm:$0xff]   ;;  %v1340_v17 = vld [vmem:[%s1641_s9] sm:$0xff]  }
  0xdf   : > { %v1229_v23 = vpop.f32.mrf.mxu0 }
  0xe0   : > { %1323 = vrot.lane.b32.xlu0 %v1322_v22, %s1393_s22  ;;  %v752_v25 = vsel %vm747_vm2, %v729_v21, 0 }
  0xe1   : > { %1247 = vmatpush3.bf16.xpose.msra.mxu1 %v752_v25  ;;  %v707_v28 = vpop.f32.mrf.mxu0 }
  0xe2   : > { %1258 = vmatprep.subr.bf16.mxu1 %v1391_v1  ;;  %v708_v30 = vadd.f32 %v1184_v27, %v707_v28 }
  0xe3   : > { %v1244_v29 = vpop.f32.mrf.mxu0 }
  0xe4   : > { %716 = vrot.lane.b32.xlu0 %v714_v24, %s1393_s22  ;;  %v1022_v29 = vunpack.c.l.bf16 %v1536_v6 }
  0xe5   : > { %v710_v31 = vpop.f32.mrf.mxu0 }
  0xe6   : > { %v711_v32 = vadd.f32 %v1184_v27, %v710_v31 }
  0xe7   : > { %v1245_v33 = vpop.f32.mrf.mxu0 }
  0xe8   : > { %1249 = vmatmul.mubr.msk.bf16.vlgmr.msra.gmra.mxu1 %vm747_vm2, %v719_v26  ;;  %v1327_v34 = vpack.i.bf16 %v711_v32, %v708_v30  ;;  %v739_v35 = vpack.c.bf16 %v711_v32, %v708_v30 }
  0xe9   : > { %1260 = vmatprep.mubr.msk.bf16.mxu1 %vm1392_vm0, %v1391_v1 }
  0xea   : > { %1259 = vmatpush3.bf16.msra.mxu1 %v739_v35 }
  0xeb   : > { %1270 = vmatprep.subr.bf16.mxu1 %v1391_v1 }
 0x152   : > { %v1324_v36 = vpop.permute.xlu0 %1323 }
 0x153   : > { %v1326_v37 = vunpack.i.h.bf16 %v1324_v36  ;;  %v1325_v38 = vunpack.i.l.bf16 %v1324_v36 }
 0x155   : > { %v730_v39 = vpack.c.bf16 %v1326_v37, %v1325_v38 }
 0x156   : > { %v717_v41 = vpop.permute.xlu0 %716 }
 0x157   : > { %v798_v40 = vsel %vm747_vm2, %v730_v39, 0  ;;  %v720_v42 = vpack.c.bf16 %v717_v41, %v717_v41 }
 0x158   : > { %1253 = vmatpush3.bf16.xpose.msra.mxu0 %v798_v40 }
 0x159   : > { %1264 = vmatprep.subr.bf16.mxu0 %v1391_v1 }
 0x15f   : > { %1255 = vmatmul.mubr.msk.bf16.vlgmr.msra.gmra.mxu0 %vm747_vm2, %v720_v42 }
 0x160   : > { %1266 = vmatprep.mubr.msk.bf16.mxu0 %vm1392_vm0, %v1391_v1 }
 0x1a8   : > { %v788_v43 = vpop.f32.mrf.mxu1 }
 0x1a9   : > { %v789_v51 = vadd.f32 %v1188_v47, %v788_v43 }
 0x1aa   : > { %v1250_v44 = vpop.f32.mrf.mxu1 }
 0x1ab   : > { %v840_v55 = vsel %vm747_vm2, %v789_v51, -inf }
 0x1ac   : > { %v791_v45 = vpop.f32.mrf.mxu1 }
 0x1ad   : > { %v1197_v45 = vld [vmem:[%s1643_s11] ss:$0 sm:$0xff] }
 0x1ae   : > { %v1251_v46 = vpop.f32.mrf.mxu1 }
 0x21f   : > { %v834_v48 = vpop.f32.mrf.mxu0 }
 0x220   : > { %v835_v49 = vadd.f32 %v1188_v47, %v834_v48  ;;  %v1198_v47 = vld [vmem:[%s1644_s12] ss:$0 sm:$0xff] }
 0x221   : > { %v1256_v50 = vpop.f32.mrf.mxu0 }
 0x222   : > { %v843_v52 = vsel %vm747_vm2, %v835_v49, -inf }
 0x223   : > { %844 = vmax.xlane.f32.xlu1 %v843_v52  ;;  %v837_v53 = vpop.f32.mrf.mxu0 }
 0x225   : > { %v1257_v54 = vpop.f32.mrf.mxu0 }
 0x227   : > { %841 = vmax.xlane.f32.xlu1 %v840_v55 }
 0x238   : > { %1328 = vrot.lane.b32.xlu1 %v1327_v34, %s1393_s22  ;;  %s1394_s22 = smov 16  }
 0x2ac   : > { %v845_v56 = vpop.xlane.xlu1 %844 }
 0x2ad   : > { %v847_v57 = vsub.f32 %v835_v49, %v845_v56 }
 0x2af   : > { %v850_v58 = vmul.f32 1.442695, %v847_v57 }
 0x2b0   : > { %v842_v59 = vpop.xlane.xlu1 %841 }
 0x2b1   : > { %1341 = vpow2.f32 %v850_v58  ;;  %v846_v60 = vsub.f32 %v789_v51, %v842_v59 }
 0x2b3   : > { %v848_v61 = vmul.f32 1.442695, %v846_v60 }
 0x2b4   : > { %v1329_v62 = vpop.permute.xlu1 %1328 }
 0x2b5   : > { %1343 = vpow2.f32 %v848_v61  ;;  %v1331_v63 = vunpack.i.h.bf16 %v1329_v62  ;;  %v1330_v0 = vunpack.i.l.bf16 %v1329_v62 }
 0x2b7   : > { %v740_v2 = vpack.c.bf16 %v1331_v63, %v1330_v0 }
 0x2b9   : > { %1265 = vmatpush3.bf16.msra.mxu0 %v740_v2 }
 0x2be   : > { %v1342_v3 = vpop.eup %1341 }
 0x2bf   : > { %v855_v4 = vsel %vm747_vm2, %v1342_v3, 0.0 }
 0x2c0   : > { %856 = vadd.xlane.f32.xlu0 %v855_v4 }
 0x2c2   : > { %v1344_v5 = vpop.eup %1343 }
 0x2c3   : > { %v852_v7 = vsel %vm747_vm2, %v1344_v5, 0.0 }
 0x2c4   : > { %853 = vadd.xlane.f32.xlu1 %v852_v7 }
 0x349   : > { %v857_v8 = vpop.xlane.xlu0 %856 }
 0x34a   : > { %1345 = vrcp.f32 %v857_v8 }
 0x34d   : > { %v854_v9 = vpop.xlane.xlu1 %853 }
 0x34e   : > { %1347 = vrcp.f32 %v854_v9 }
 0x357   : > { %v1346_v10 = vpop.eup %1345 }
 0x358   : > { %v861_v11 = vmul.f32 %v1346_v10, %v1342_v3 }
 0x35a   : > { %v863_v12 = vpack.c.bf16 %v861_v11, %v861_v11 }
 0x35b   : > { %v1348_v13 = vpop.eup %1347 }
 0x35c   : > { %1267 = vmatmul.mubr.msk.bf16.vlgmr.msra.gmra.mxu0 %vm747_vm2, %v863_v12  ;;  %v860_v14 = vmul.f32 %v1348_v13, %v1344_v5 }
 0x35e   : > { %v862_v15 = vpack.c.bf16 %v860_v14, %v860_v14 }
 0x360   : > { %1261 = vmatmul.mubr.msk.bf16.vlgmr.msra.gmra.mxu1 %vm747_vm2, %v862_v15 }
 0x361   : > { %1274 = vmatprep.mubr.msk.bf16.mxu1 %vm1392_vm0, %v1391_v1  ;;  %1271 = vmatpush3.bf16.msra.mxu1 %v1339_v16 }
 0x362   : > { %1272 = vmatprep.subr.bf16.mxu1 %v1391_v1  ;;  %v1193_v1 = vld [vmem:[%s1642_s10] ss:$0 sm:$0xff] }
 0x365   : > { %1273 = vmatpush3.bf16.msra.mxu1 %v1340_v17 }
 0x41c   : > { %v944_v18 = vpop.f32.mrf.mxu0 }
 0x41d   : > { %951 = vrot.lane.b32.xlu0 %v944_v18, %s1394_s22 }
 0x41e   : > { %v1268_v19 = vpop.f32.mrf.mxu0 }
 0x420   : > { %v901_v20 = vpop.f32.mrf.mxu1  ;;  %v947_v21 = vpop.f32.mrf.mxu0 }
 0x422   : > { %v1262_v22 = vpop.f32.mrf.mxu1  ;;  %v1269_v23 = vpop.f32.mrf.mxu0 }
 0x424   : > { %v904_v24 = vpop.f32.mrf.mxu1 }
 0x426   : > { %v1263_v25 = vpop.f32.mrf.mxu1 }
 0x48f   : > { %v952_v26 = vpop.permute.xlu0 %951 }
 0x490   : > { %v954_v27 = vsel %vm747_vm2, %v901_v20, %v952_v26 }
 0x491   : > { %v955_v28 = vpack.c.bf16 %v954_v27, %v954_v27 }
 0x493   : > { %1275 = vmatmul.mubr.msk.bf16.vlgmr.msra.gmra.mxu1 %vm534_vm1, %v955_v28 }
 0x553   : > { %v1016_v30 = vpop.f32.mrf.mxu1 }
 0x554   : > { %v1017_v31 = vadd.f32 %v1193_v1, %v1016_v30 }
 0x555   : > { %v1276_v32 = vpop.f32.mrf.mxu1 }
 0x556   : > { %v1023_v33 = vadd.f32 %v1022_v29, %v1017_v31 }
 0x557   : > { %v1019_v34 = vpop.f32.mrf.mxu1 }
 0x558   : > { %v1026_v35 = vsel %vm534_vm1, %v1023_v33, 0.0 }
 0x559   : > { %1027 = vadd.xlane.f32.xlu0 %v1026_v35  ;;  %v1277_v36 = vpop.f32.mrf.mxu1 }
 0x5e2   : > { %v1028_v37 = vpop.xlane.xlu0 %1027 }
 0x5e3   : > { %v1030_v38 = vmul.f32 0.03125, %v1028_v37 }
 0x5e5   : > { %v1031_v39 = vsub.f32 %v1023_v33, %v1030_v38 }
 0x5e7   : > { %v1032_v40 = vmul.f32 %v1031_v39, %v1031_v39 }
 0x5e9   : > { %v1033_v41 = vsel %vm534_vm1, %v1032_v40, 0.0 }
 0x5ea   : > { %1034 = vadd.xlane.f32.xlu1 %v1033_v41 }
 0x673   : > { %v1035_v42 = vpop.xlane.xlu1 %1034 }
 0x674   : > { %v1036_v43 = vmul.f32 0.03125, %v1035_v42 }
 0x676   : > { %v1037_v6 = vadd.f32 1e-12, %v1036_v43 }
 0x678   : > { %1349 = vrsqrt.f32 %v1037_v6 }
 0x685   : > { %v1350_v44 = vpop.eup %1349 }
 0x686   : > { %v1039_v46 = vmul.f32 %v1350_v44, %v1031_v39 }
 0x688   : > { %v1046_v48 = vmul.f32 %v1197_v45, %v1039_v46 }
 0x68a   : > { %v1053_v49 = vadd.f32 %v1198_v47, %v1046_v48 }
 0x68c   : > { %v1054_v50 = vpack.c.bf16 %v1053_v49, %v1053_v49 }
 0x68e   : > { %1056 = vst.msk [vmem:[%s505_s21] sm:$0xf] %vm1055_vm3, %v1054_v50 }
 0x68f PF: > { %s23_s29 = sadd.s32 1, %s1389_s29   ;;  %s1646_s25 = smov %s1381_s27 }
 0x690   : > { %p20_p7 = scmp.ge.s32.totalorder %s23_s29, 6   ;;  %s1647_s26 = smov %s1385_s28 }
 0x691   : > { %s1648_s27 = smov %s1651_s30  ;;  %s1649_s28 = smov %s1655_s14 }
 0x692   :  { %22 = sbr.rel (!%p20_p7) target bundleno = 3 (0x3), region = 108 }

</bundles_post_ra>
